<compile_context>
chip_gen: v6e
topology: v6e:2x2x1
jax: 0.10.0
libtpu: 0.0.40
codegen_flags: <defaults>
</compile_context>

<pallas_src>
import jax
import jax.numpy as jnp
from jax import lax
from jax.experimental import pallas as pl
from jax.experimental.pallas import tpu as pltpu


# ---------------------------------------------------------------------------
# Pass 1: fused QKV projection  (x [S,D] @ W_all [D,3*H*D] -> qkv [S,3*H*D])
# ---------------------------------------------------------------------------
def _qkv_proj_kernel(x_ref, w_ref, o_ref):
    x = x_ref[...]                                   # (TS, D)   bf16
    w = w_ref[...]                                   # (D, 3HD)  bf16
    acc = jnp.dot(x, w, preferred_element_type=jnp.float32)
    o_ref[...] = acc.astype(o_ref.dtype)             # bf16 intermediate


# ---------------------------------------------------------------------------
# Pass 2: per-(head, q-tile) attention, writing the [S, H*D] output slab.
# ---------------------------------------------------------------------------
def _attn_kernel(q_ref, k_ref, v_ref, o_ref):
    q = q_ref[...]                                   # (TQ, D) bf16, pre-scaled
    k = k_ref[...]                                   # (S,  D) bf16
    v = v_ref[...]                                   # (S,  D) bf16

    # scores = q @ k^T expressed as a contraction (no K transpose / copy).
    s = lax.dot_general(q, k, (((1,), (1,)), ((), ())),
                        preferred_element_type=jnp.float32)      # (TQ, S) f32

    # Numerically stable softmax over the key axis (torch dim=1), in f32.
    m = jnp.max(s, axis=-1, keepdims=True)
    e = jnp.exp(s - m)
    denom = jnp.sum(e, axis=-1, keepdims=True)
    p = e * pl.reciprocal(denom, approx=True)                    # (TQ, S) f32

    out = jnp.dot(p.astype(jnp.bfloat16), v,
                  preferred_element_type=jnp.float32)            # (TQ, D) f32
    o_ref[...] = out.astype(o_ref.dtype)


def multi_head_attention(x, wq, wk, wv):
    """x: [S, D] f32; wq/wk/wv: [H, D, D] (pre-transposed nn.Linear weights).

    Returns [S, H*D] f32 == torch.cat([head_h(x) for h], dim=1).
    """
    S, D = x.shape
    H = wq.shape[0]

    # ---- weight packing (one-time prep, outside the kernels) -------------
    scale = 1.0 / (float(D) ** 0.5)
    # per head: [Wq*scale | Wk | Wv]  ->  [H, D, 3D]  ->  [D, 3*H*D]
    w_packed = jnp.concatenate([wq * scale, wk, wv], axis=-1)
    w_all = jnp.transpose(w_packed, (1, 0, 2)).reshape(D, 3 * H * D)

    x_bf = x.astype(jnp.bfloat16)
    w_bf = w_all.astype(jnp.bfloat16)

    # ---- pass 1: fused QKV projection -------------------------------------
    TS = 128 if S % 128 == 0 else S
    qkv = pl.pallas_call(
        _qkv_proj_kernel,
        out_shape=jax.ShapeDtypeStruct((S, 3 * H * D), jnp.bfloat16),
        grid_spec=pltpu.PrefetchScalarGridSpec(
            num_scalar_prefetch=0,
            grid=(S // TS,),
            in_specs=[
                pl.BlockSpec((TS, D), lambda i: (i, 0)),          # x rows
                pl.BlockSpec((D, 3 * H * D), lambda i: (0, 0)),   # W_all (resident)
            ],
            out_specs=pl.BlockSpec((TS, 3 * H * D), lambda i: (i, 0)),
        ),
        compiler_params=pltpu.CompilerParams(
            dimension_semantics=("parallel",)),
    )(x_bf, w_bf)

    # ---- pass 2: attention, lane-dense [S, H*D] output ---------------------
    TQ = 128 if S % 128 == 0 else S
    num_q = S // TQ

    out = pl.pallas_call(
        _attn_kernel,
        out_shape=jax.ShapeDtypeStruct((S, H * D), x.dtype),
        grid_spec=pltpu.PrefetchScalarGridSpec(
            num_scalar_prefetch=0,
            grid=(H, num_q),
            in_specs=[
                # Q tile of head h (columns 3h*D .. 3h*D+D of packed qkv)
                pl.BlockSpec((TQ, D), lambda h, qi: (qi, 3 * h)),
                # full K of head h
                pl.BlockSpec((S, D), lambda h, qi: (0, 3 * h + 1)),
                # full V of head h
                pl.BlockSpec((S, D), lambda h, qi: (0, 3 * h + 2)),
            ],
            # head h writes its column slab of the final [S, H*D] output.
            out_specs=pl.BlockSpec((TQ, D), lambda h, qi: (qi, h)),
        ),
        compiler_params=pltpu.CompilerParams(
            dimension_semantics=("parallel", "parallel")),
    )(qkv, qkv, qkv)

    return out


def _reference(x, wq, wk, wv):
    """Pure-JAX f32 reference matching the PyTorch forward exactly."""
    outs = []
    D = x.shape[1]
    for h in range(wq.shape[0]):
        q = x @ wq[h]
        k = x @ wk[h]
        v = x @ wv[h]
        sims = q @ k.T
        scaled = sims / jnp.sqrt(jnp.float32(D))
        attn = jax.nn.softmax(scaled, axis=1)
        outs.append(attn @ v)
    return jnp.concatenate(outs, axis=1)


if __name__ == "__main__":
    S = 128        # sequence length
    D = 128        # d_model (multiple of 128 -> lane-dense)
    H = 4          # num_heads (even -> balances v7x's 2 TensorCores)

    key = jax.random.PRNGKey(0)
    kx, kq, kk, kv = jax.random.split(key, 4)

    x = jax.random.normal(kx, (S, D), dtype=jnp.float32)
    # Deterministic "Linear" weights (uniform like torch's default init scale),
    # stored pre-transposed so that q = x @ Wq[h].
    bound = 1.0 / jnp.sqrt(jnp.float32(D))
    wq = jax.random.uniform(kq, (H, D, D), jnp.float32, -bound, bound)
    wk = jax.random.uniform(kk, (H, D, D), jnp.float32, -bound, bound)
    wv = jax.random.uniform(kv, (H, D, D), jnp.float32, -bound, bound)

    out = jax.block_until_ready(multi_head_attention(x, wq, wk, wv))
    ref = _reference(x, wq, wk, wv)

    assert out.shape == (S, H * D), out.shape
    # bf16 MXU inputs (f32 accumulate) => loosened tolerance vs f32 reference.
    assert jnp.allclose(out, ref, atol=2e-2, rtol=2e-2), "mismatch vs reference"

    print("KERNEL_OK")
</pallas_src>

<mosaic_0001>
module attributes {stable_mosaic.version = 11 : i64} {
  func.func @_qkv_proj_kernel(%arg0: i32, %arg1: memref<128x128xbf16, #tpu.memory_space<vmem>>, %arg2: memref<128x1536xbf16, #tpu.memory_space<vmem>>, %arg3: memref<128x1536xbf16, #tpu.memory_space<vmem>>) attributes {dimension_semantics = [#tpu.dimension_semantics<parallel>], iteration_bounds = array<i64: 1>, scalar_prefetch = 0 : i64, scratch_operands = 0 : i64, tpu.core_type = #tpu.core_type<tc>, window_params = [{transform_indices = @transform_0, window_bounds = array<i64: 128, 128>}, {pipeline_mode = #tpu.pipeline_mode<synchronous>, transform_indices = @transform_1, window_bounds = array<i64: 128, 1536>}, {transform_indices = @transform_2, window_bounds = array<i64: 128, 1536>}]} {
    %c0 = arith.constant 0 : index
    %c0_0 = arith.constant 0 : index
    %0 = vector.load %arg1[%c0, %c0_0] : memref<128x128xbf16, #tpu.memory_space<vmem>>, vector<128x128xbf16>
    %c0_1 = arith.constant 0 : index
    %c0_2 = arith.constant 0 : index
    %1 = vector.load %arg2[%c0_1, %c0_2] : memref<128x1536xbf16, #tpu.memory_space<vmem>>, vector<128x1536xbf16>
    %cst = arith.constant dense<0.000000e+00> : vector<128x1536xf32>
    %2 = tpu.matmul %0, %1, %cst {dimension_numbers = #tpu.dot_dimension_numbers<[1], [0], [0], [1], [0, 0, 1, 1], [], []>} : vector<128x128xbf16>, vector<128x1536xbf16>, vector<128x1536xf32> -> vector<128x1536xf32>
    %3 = arith.truncf %2 : vector<128x1536xf32> to vector<128x1536xbf16>
    %c0_3 = arith.constant 0 : index
    %c0_4 = arith.constant 0 : index
    %4 = vector.load %arg3[%c0_3, %c0_4] : memref<128x1536xbf16, #tpu.memory_space<vmem>>, vector<128x1536xbf16>
    tpu.vector_store %arg3[%c0_3, %c0_4], %3 {strides = array<i32>} : memref<128x1536xbf16, #tpu.memory_space<vmem>>, vector<128x1536xbf16>,
    return
  }
  func.func @transform_0(%arg0: i32) -> (i32, i32) {
    %c0_i32 = arith.constant 0 : i32
    %c0_i32_0 = arith.constant 0 : i32
    return %arg0, %c0_i32 : i32, i32
  }
  func.func @transform_1(%arg0: i32) -> (i32, i32) {
    %c0_i32 = arith.constant 0 : i32
    %c0_i32_0 = arith.constant 0 : i32
    %c0_i32_1 = arith.constant 0 : i32
    return %c0_i32, %c0_i32_0 : i32, i32
  }
  func.func @transform_2(%arg0: i32) -> (i32, i32) {
    %c0_i32 = arith.constant 0 : i32
    %c0_i32_0 = arith.constant 0 : i32
    return %arg0, %c0_i32 : i32, i32
  }
}

</mosaic_0001>

<bundles_post_ra>
// kernel: tpu_custom_call.1
= control target key start
LH: loop header
LB: loop body
LE: loop exit
PB: predicated region body
PF: predicated region fallthrough
CT: control target
= control target key end

     0   :  { %7 = vsyncpa [#allocation3], 0  ;;  %s2721_s0 = inlined_call_operand.hbm [shape: bf16[128,128], index: 0, kind: input, shape index: {}]   ;;  %s2722_s1 = inlined_call_operand.hbm [shape: bf16[128,1536], index: 1, kind: input, shape index: {}]   ;;  %s2723_s2 = inlined_call_operand.hbm [shape: bf16[128,1536], index: 2, kind: output, shape index: {}]  }
   0x1   :  { %8 = vsyncpa [#allocation6], 0 }
   0x2   :  { %9 = vsyncpa [#allocation4], 0  ;;  %s2571_s9 = smov [#allocation2]  }
   0x3   :  { %s15_s10 = sshll.u32 %s2571_s9, 4  ;;  %s16_s10 = int_to_ptr.vmem [resolvable:$true] %s15_s10 }
   0x4   :  { %s2513_s11 = scalar_lea.vmem %s16_s10, 1024  ;;  %p2518_p1 = scmp.lt.s32.totalorder %s16_s10, %s16_s10 }
   0x5   :  { %p2514_p0 = scmp.ne.s32.totalorder %s16_s10, %s2513_s11  ;;  %p2519_p2 = scmp.lt.s32.totalorder %s2513_s11, %s2513_s11 }
   0x7   :  { %p2520_p3 = por %p2519_p2, %p2518_p1 }
   0x9   :  { %p2521_p4 = pnand %p2520_p3, %p2514_p0 }
   0xb   :  { %2524 = shalt.err (!%p2521_p4)
}
   0xc   :  { %s2572_s12 = smov 64   ;;  %s2573_s13 = smov 4  }
   0xd   :  { %21 = dma.hbm_to_vmem [thread:$0]  %s2721_s0, 1024, %s16_s10, [#allocation3], %s2572_s12, %s2572_s12, %s2573_s13  }
   0xe   :  { %s2574_s16 = smov [#allocation5]  }
   0xf   :  { %s27_s17 = sshll.u32 %s2574_s16, 4  ;;  %s28_s17 = int_to_ptr.vmem [resolvable:$true] %s27_s17 }
  0x10   :  { %s2533_s18 = scalar_lea.vmem %s28_s17, 12288  ;;  %p2538_p6 = scmp.lt.s32.totalorder %s28_s17, %s28_s17 }
  0x11   :  { %p2534_p5 = scmp.ne.s32.totalorder %s28_s17, %s2533_s18  ;;  %p2539_p7 = scmp.lt.s32.totalorder %s2533_s18, %s2533_s18 }
  0x13   :  { %p2540_p8 = por %p2539_p7, %p2538_p6 }
  0x15   :  { %p2541_p9 = pnand %p2540_p8, %p2534_p5 }
  0x17   :  { %2544 = shalt.err (!%p2541_p9)
}
  0x18   :  { %s2575_s19 = smov 768   ;;  %s2576_s20 = smov 48  }
  0x19   :  { %33 = dma.hbm_to_vmem [thread:$0]  %s2722_s1, 12288, %s28_s17, [#allocation6], %s2575_s19, %s2575_s19, %s2576_s20  }
  0x1a   :  { %2565 = dma.done.wait [#allocation3], 1024  }
  0x1b   :  { %2566 = vsyncadd [#allocation3], 4294966272 }
  0x1c   :  { %2567 = dma.done.wait [#allocation6], 12288  }
  0x1d   :  { %2568 = vsyncadd [#allocation6], 4294955008  ;;  %v2577_v0 = vmov 0   ;;  %v2353_v1 = vld [vmem:[#allocation5 + $0x2a4] ss:$48 sps:$4 sm:$0xff]   ;;  %v2611_v44 = vld [vmem:[#allocation2 + $0x8] sm:$0xff]  }
  0x1e   :  { %713 = vmatprep.mubr.bf16.mxu0 %v2577_v0  ;;  %826 = vmatprep.mubr.bf16.mxu1 %v2577_v0  ;;  %v2355_v2 = vld [vmem:[#allocation5 + $0x2ac] ss:$48 sps:$4 sm:$0xff]   ;;  %v2357_v3 = vld [vmem:[#allocation5 + $0x2a0] ss:$48 sps:$4 sm:$0xff]   ;;  %v2358_v4 = vld [vmem:[#allocation5 + $0x2a8] ss:$48 sps:$4 sm:$0xff]  }
  0x1f   :  { %681 = vmatprep.subr.bf16.mxu0 %v2353_v1  ;;  %794 = vmatprep.subr.bf16.mxu1 %v2355_v2  ;;  %v2359_v5 = vld [vmem:[#allocation5 + $0x244] ss:$48 sps:$4 sm:$0xff]   ;;  %v2361_v6 = vld [vmem:[#allocation5 + $0x24c] ss:$48 sps:$4 sm:$0xff]   ;;  %v2363_v7 = vld [vmem:[#allocation5 + $0x240] ss:$48 sps:$4 sm:$0xff]  }
  0x20   :  { %682 = vmatpush1.bf16.msra.mxu0 %v2357_v3  ;;  %795 = vmatpush1.bf16.msra.mxu1 %v2358_v4  ;;  %v2364_v8 = vld [vmem:[#allocation5 + $0x248] ss:$48 sps:$4 sm:$0xff]   ;;  %v2365_v9 = vld [vmem:[#allocation5 + $0x1e4] ss:$48 sps:$4 sm:$0xff]   ;;  %v2367_v10 = vld [vmem:[#allocation5 + $0x1ec] ss:$48 sps:$4 sm:$0xff]  }
  0x21   :  { %683 = vmatprep.subr.bf16.mxu0 %v2359_v5  ;;  %796 = vmatprep.subr.bf16.mxu1 %v2361_v6  ;;  %v2369_v11 = vld [vmem:[#allocation5 + $0x1e0] ss:$48 sps:$4 sm:$0xff]   ;;  %v2370_v12 = vld [vmem:[#allocation5 + $0x1e8] ss:$48 sps:$4 sm:$0xff]   ;;  %v2371_v13 = vld [vmem:[#allocation5 + $0x184] ss:$48 sps:$4 sm:$0xff]  }
  0x22   :  { %v2373_v14 = vld [vmem:[#allocation5 + $0x18c] ss:$48 sps:$4 sm:$0xff]   ;;  %v2375_v15 = vld [vmem:[#allocation5 + $0x180] ss:$48 sps:$4 sm:$0xff]   ;;  %v2376_v16 = vld [vmem:[#allocation5 + $0x188] ss:$48 sps:$4 sm:$0xff]  }
  0x23   :  { %v2377_v17 = vld [vmem:[#allocation5 + $0x124] ss:$48 sps:$4 sm:$0xff]   ;;  %v2379_v18 = vld [vmem:[#allocation5 + $0x12c] ss:$48 sps:$4 sm:$0xff]   ;;  %v2381_v19 = vld [vmem:[#allocation5 + $0x120] ss:$48 sps:$4 sm:$0xff]  }
  0x24   :  { %684 = vmatpush1.bf16.msra.mxu0 %v2363_v7  ;;  %797 = vmatpush1.bf16.msra.mxu1 %v2364_v8  ;;  %v2382_v20 = vld [vmem:[#allocation5 + $0x128] ss:$48 sps:$4 sm:$0xff]   ;;  %v2383_v21 = vld [vmem:[#allocation5 + $0xc4] ss:$48 sps:$4 sm:$0xff]   ;;  %v2385_v22 = vld [vmem:[#allocation5 + $0xcc] ss:$48 sps:$4 sm:$0xff]  }
  0x25   :  { %685 = vmatprep.subr.bf16.mxu0 %v2365_v9  ;;  %798 = vmatprep.subr.bf16.mxu1 %v2367_v10  ;;  %v2387_v23 = vld [vmem:[#allocation5 + $0xc0] ss:$48 sps:$4 sm:$0xff]   ;;  %v2388_v24 = vld [vmem:[#allocation5 + $0xc8] ss:$48 sps:$4 sm:$0xff]   ;;  %v2389_v25 = vld [vmem:[#allocation5 + $0x64] ss:$48 sps:$4 sm:$0xff]  }
  0x26   :  { %v2391_v26 = vld [vmem:[#allocation5 + $0x6c] ss:$48 sps:$4 sm:$0xff]   ;;  %v2393_v27 = vld [vmem:[#allocation5 + $0x60] ss:$48 sps:$4 sm:$0xff]   ;;  %v2394_v28 = vld [vmem:[#allocation5 + $0x68] ss:$48 sps:$4 sm:$0xff]  }
  0x27   :  { %v2395_v29 = vld [vmem:[#allocation5 + $0x4] ss:$48 sps:$4 sm:$0xff]   ;;  %v2397_v30 = vld [vmem:[#allocation5 + $0xc] ss:$48 sps:$4 sm:$0xff]   ;;  %v2399_v31 = vld [vmem:[#allocation5] ss:$48 sps:$4 sm:$0xff]  }
  0x28   :  { %686 = vmatpush1.bf16.msra.mxu0 %v2369_v11  ;;  %799 = vmatpush1.bf16.msra.mxu1 %v2370_v12  ;;  %v2400_v32 = vld [vmem:[#allocation5 + $0x8] ss:$48 sps:$4 sm:$0xff]   ;;  %v2404_v33 = vld [vmem:[#allocation5 + $0x2b4] ss:$48 sps:$4 sm:$0xff]   ;;  %v2407_v34 = vld [vmem:[#allocation5 + $0x2bc] ss:$48 sps:$4 sm:$0xff]  }
  0x29   :  { %687 = vmatprep.subr.bf16.mxu0 %v2371_v13  ;;  %800 = vmatprep.subr.bf16.mxu1 %v2373_v14  ;;  %v2605_v35 = vld [vmem:[#allocation2] sm:$0xff]   ;;  %v2405_v37 = vld [vmem:[#allocation5 + $0x2b8] ss:$48 sps:$4 sm:$0xff]   ;;  %v2414_v39 = vld [vmem:[#allocation5 + $0x25c] ss:$48 sps:$4 sm:$0xff]   ;;  %s2578_s0 = smov [#allocation7]  }
  0x2a   :  { %v2402_v36 = vld [vmem:[#allocation5 + $0x2b0] ss:$48 sps:$4 sm:$0xff]   ;;  %v2411_v38 = vld [vmem:[#allocation5 + $0x254] ss:$48 sps:$4 sm:$0xff]   ;;  %v2412_v41 = vld [vmem:[#allocation5 + $0x258] ss:$48 sps:$4 sm:$0xff]  }
  0x2b   :  { %v2409_v40 = vld [vmem:[#allocation5 + $0x250] ss:$48 sps:$4 sm:$0xff]   ;;  %v2418_v42 = vld [vmem:[#allocation5 + $0x1f4] ss:$48 sps:$4 sm:$0xff]   ;;  %v2421_v43 = vld [vmem:[#allocation5 + $0x1fc] ss:$48 sps:$4 sm:$0xff]  }
  0x2c   :  { %688 = vmatpush1.bf16.msra.mxu0 %v2375_v15  ;;  %801 = vmatpush1.bf16.msra.mxu1 %v2376_v16  ;;  %v2416_v45 = vld [vmem:[#allocation5 + $0x1f0] ss:$48 sps:$4 sm:$0xff]   ;;  %v2419_v46 = vld [vmem:[#allocation5 + $0x1f8] ss:$48 sps:$4 sm:$0xff]   ;;  %v2425_v47 = vld [vmem:[#allocation5 + $0x194] ss:$48 sps:$4 sm:$0xff]  }
  0x2d   :  { %689 = vmatprep.subr.bf16.mxu0 %v2377_v17  ;;  %802 = vmatprep.subr.bf16.mxu1 %v2379_v18  ;;  %v2428_v48 = vld [vmem:[#allocation5 + $0x19c] ss:$48 sps:$4 sm:$0xff]   ;;  %v2423_v49 = vld [vmem:[#allocation5 + $0x190] ss:$48 sps:$4 sm:$0xff]   ;;  %v2426_v50 = vld [vmem:[#allocation5 + $0x198] ss:$48 sps:$4 sm:$0xff]  }
  0x2e   :  { %v2432_v51 = vld [vmem:[#allocation5 + $0x134] ss:$48 sps:$4 sm:$0xff]   ;;  %v2435_v52 = vld [vmem:[#allocation5 + $0x13c] ss:$48 sps:$4 sm:$0xff]   ;;  %v2430_v54 = vld [vmem:[#allocation5 + $0x130] ss:$48 sps:$4 sm:$0xff]  }
  0x2f   :  { %v2617_v53 = vld [vmem:[#allocation2 + $0x10] sm:$0xff]   ;;  %v2433_v55 = vld [vmem:[#allocation5 + $0x138] ss:$48 sps:$4 sm:$0xff]   ;;  %v2442_v57 = vld [vmem:[#allocation5 + $0xdc] ss:$48 sps:$4 sm:$0xff]   ;;  %s2036_s1 = sshll.u32 %s2578_s0, 4  ;;  %s2037_s1 = int_to_ptr.vmem [resolvable:$true] %s2036_s1 }
  0x30   :  { %690 = vmatpush1.bf16.msra.mxu0 %v2381_v19  ;;  %803 = vmatpush1.bf16.msra.mxu1 %v2382_v20  ;;  %v2439_v56 = vld [vmem:[#allocation5 + $0xd4] ss:$48 sps:$4 sm:$0xff]   ;;  %v2437_v58 = vld [vmem:[#allocation5 + $0xd0] ss:$48 sps:$4 sm:$0xff]   ;;  %v2440_v59 = vld [vmem:[#allocation5 + $0xd8] ss:$48 sps:$4 sm:$0xff]   ;;  %p2550_p11 = scmp.lt.s32.totalorder %s2037_s1, %s2037_s1 }
  0x31   :  { %691 = vmatprep.subr.bf16.mxu0 %v2383_v21  ;;  %804 = vmatprep.subr.bf16.mxu1 %v2385_v22  ;;  %v2446_v60 = vld [vmem:[#allocation5 + $0x74] ss:$48 sps:$4 sm:$0xff]   ;;  %v2449_v61 = vld [vmem:[#allocation5 + $0x7c] ss:$48 sps:$4 sm:$0xff]   ;;  %v2444_v63 = vld [vmem:[#allocation5 + $0x70] ss:$48 sps:$4 sm:$0xff]  }
  0x32   :  { %v2623_v62 = vld [vmem:[#allocation2 + $0x18] sm:$0xff]   ;;  %v2453_v2 = vld [vmem:[#allocation5 + $0x14] ss:$48 sps:$4 sm:$0xff]   ;;  %v2451_v4 = vld [vmem:[#allocation5 + $0x10] ss:$48 sps:$4 sm:$0xff]   ;;  %s2545_s23 = scalar_lea.vmem %s2037_s1, 12288 }
  0x33   :  { %v2447_v1 = vld [vmem:[#allocation5 + $0x78] ss:$48 sps:$4 sm:$0xff]   ;;  %v2456_v3 = vld [vmem:[#allocation5 + $0x1c] ss:$48 sps:$4 sm:$0xff]   ;;  %v2459_v6 = vld [vmem:[#allocation5 + $0x2c4] ss:$48 sps:$4 sm:$0xff]   ;;  %p2546_p10 = scmp.ne.s32.totalorder %s2037_s1, %s2545_s23  ;;  %p2551_p12 = scmp.lt.s32.totalorder %s2545_s23, %s2545_s23 }
  0x34   :  { %692 = vmatpush1.bf16.msra.mxu0 %v2387_v23  ;;  %805 = vmatpush1.bf16.msra.mxu1 %v2388_v24  ;;  %v2454_v5 = vld [vmem:[#allocation5 + $0x18] ss:$48 sps:$4 sm:$0xff]   ;;  %v2462_v7 = vld [vmem:[#allocation5 + $0x2cc] ss:$48 sps:$4 sm:$0xff]   ;;  %v2629_v8 = vld [vmem:[#allocation2 + $0x20] sm:$0xff]  }
  0x35   :  { %693 = vmatprep.subr.bf16.mxu0 %v2389_v25  ;;  %806 = vmatprep.subr.bf16.mxu1 %v2391_v26  ;;  %v2635_v9 = vld [vmem:[#allocation2 + $0x28] sm:$0xff]   ;;  %v2641_v10 = vld [vmem:[#allocation2 + $0x30] sm:$0xff]   ;;  %v2647_v11 = vld [vmem:[#allocation2 + $0x38] sm:$0xff]   ;;  %p2552_p13 = por %p2551_p12, %p2550_p11 }
  0x36   :  { %v2457_v12 = vld [vmem:[#allocation5 + $0x2c0] ss:$48 sps:$4 sm:$0xff]   ;;  %v2460_v13 = vld [vmem:[#allocation5 + $0x2c8] ss:$48 sps:$4 sm:$0xff]   ;;  %v2465_v14 = vld [vmem:[#allocation5 + $0x264] ss:$48 sps:$4 sm:$0xff]  }
  0x37   :  { %v2468_v15 = vld [vmem:[#allocation5 + $0x26c] ss:$48 sps:$4 sm:$0xff]   ;;  %v2463_v16 = vld [vmem:[#allocation5 + $0x260] ss:$48 sps:$4 sm:$0xff]   ;;  %v2466_v17 = vld [vmem:[#allocation5 + $0x268] ss:$48 sps:$4 sm:$0xff]   ;;  %p2553_p0 = pnand %p2552_p13, %p2546_p10 }
  0x38   :  { %694 = vmatpush1.bf16.msra.mxu0 %v2393_v27  ;;  %807 = vmatpush1.bf16.msra.mxu1 %v2394_v28  ;;  %v2471_v18 = vld [vmem:[#allocation5 + $0x204] ss:$48 sps:$4 sm:$0xff]   ;;  %v2474_v19 = vld [vmem:[#allocation5 + $0x20c] ss:$48 sps:$4 sm:$0xff]   ;;  %v2469_v20 = vld [vmem:[#allocation5 + $0x200] ss:$48 sps:$4 sm:$0xff]  }
  0x39   :  { %695 = vmatprep.subr.bf16.mxu0 %v2395_v29  ;;  %808 = vmatprep.subr.bf16.mxu1 %v2397_v30  ;;  %v2472_v21 = vld [vmem:[#allocation5 + $0x208] ss:$48 sps:$4 sm:$0xff]   ;;  %v2477_v22 = vld [vmem:[#allocation5 + $0x1a4] ss:$48 sps:$4 sm:$0xff]   ;;  %v2480_v23 = vld [vmem:[#allocation5 + $0x1ac] ss:$48 sps:$4 sm:$0xff]  }
  0x3a   :  { %v2475_v24 = vld [vmem:[#allocation5 + $0x1a0] ss:$48 sps:$4 sm:$0xff]   ;;  %v2478_v25 = vld [vmem:[#allocation5 + $0x1a8] ss:$48 sps:$4 sm:$0xff]   ;;  %v2483_v26 = vld [vmem:[#allocation5 + $0x144] ss:$48 sps:$4 sm:$0xff]  }
  0x3b   :  { %v2486_v27 = vld [vmem:[#allocation5 + $0x14c] ss:$48 sps:$4 sm:$0xff]   ;;  %v2481_v28 = vld [vmem:[#allocation5 + $0x140] ss:$48 sps:$4 sm:$0xff]   ;;  %v2484_v29 = vld [vmem:[#allocation5 + $0x148] ss:$48 sps:$4 sm:$0xff]  }
  0x3c   :  { %696 = vmatpush1.bf16.msra.mxu0 %v2399_v31  ;;  %809 = vmatpush1.bf16.msra.mxu1 %v2400_v32  ;;  %v2489_v30 = vld [vmem:[#allocation5 + $0xe4] ss:$48 sps:$4 sm:$0xff]   ;;  %v2492_v31 = vld [vmem:[#allocation5 + $0xec] ss:$48 sps:$4 sm:$0xff]   ;;  %v2487_v32 = vld [vmem:[#allocation5 + $0xe0] ss:$48 sps:$4 sm:$0xff]  }
  0x3d   :  { %907 = vmatprep.subr.bf16.mxu0 %v2404_v33  ;;  %1020 = vmatprep.subr.bf16.mxu1 %v2407_v34  ;;  %v2490_v33 = vld [vmem:[#allocation5 + $0xe8] ss:$48 sps:$4 sm:$0xff]   ;;  %v2495_v34 = vld [vmem:[#allocation5 + $0x84] ss:$48 sps:$4 sm:$0xff]  }
  0x3f   :  { %714 = vmatmul.mubr.bf16.vlgmr.msra.gmra.mxu0 %v2605_v35  ;;  %827 = vmatmul.mubr.bf16.vlgmr.msra.gmra.mxu1 %v2605_v35 }
  0x40   :  { %908 = vmatpush1.bf16.msra.mxu0 %v2402_v36  ;;  %1021 = vmatpush1.bf16.msra.mxu1 %v2405_v37  ;;  %v2498_v36 = vld [vmem:[#allocation5 + $0x8c] ss:$48 sps:$4 sm:$0xff]   ;;  %v2493_v37 = vld [vmem:[#allocation5 + $0x80] ss:$48 sps:$4 sm:$0xff]  }
  0x41   :  { %723 = vmatprep.mubr.bf16.mxu0 %v2577_v0  ;;  %836 = vmatprep.mubr.bf16.mxu1 %v2577_v0 }
  0x42   :  { %909 = vmatprep.subr.bf16.mxu0 %v2411_v38  ;;  %1022 = vmatprep.subr.bf16.mxu1 %v2414_v39  ;;  %v2496_v38 = vld [vmem:[#allocation5 + $0x88] ss:$48 sps:$4 sm:$0xff]   ;;  %v2501_v39 = vld [vmem:[#allocation5 + $0x24] ss:$48 sps:$4 sm:$0xff]  }
  0x44   :  { %910 = vmatpush1.bf16.msra.mxu0 %v2409_v40  ;;  %1023 = vmatpush1.bf16.msra.mxu1 %v2412_v41  ;;  %v2504_v40 = vld [vmem:[#allocation5 + $0x2c] ss:$48 sps:$4 sm:$0xff]   ;;  %v2499_v41 = vld [vmem:[#allocation5 + $0x20] ss:$48 sps:$4 sm:$0xff]  }
  0x45   :  { %911 = vmatprep.subr.bf16.mxu0 %v2418_v42  ;;  %1024 = vmatprep.subr.bf16.mxu1 %v2421_v43  ;;  %v2502_v42 = vld [vmem:[#allocation5 + $0x28] ss:$48 sps:$4 sm:$0xff]  }
  0x47   :  { %724 = vmatmul.mubr.bf16.gmra.mxu0 %v2611_v44  ;;  %837 = vmatmul.mubr.bf16.gmra.mxu1 %v2611_v44 }
  0x48   :  { %733 = vmatprep.mubr.bf16.mxu0 %v2577_v0  ;;  %846 = vmatprep.mubr.bf16.mxu1 %v2577_v0 }
  0x49   :  { %912 = vmatpush1.bf16.msra.mxu0 %v2416_v45  ;;  %1025 = vmatpush1.bf16.msra.mxu1 %v2419_v46 }
  0x4a   :  { %913 = vmatprep.subr.bf16.mxu0 %v2425_v47  ;;  %1026 = vmatprep.subr.bf16.mxu1 %v2428_v48 }
  0x4d   :  { %914 = vmatpush1.bf16.msra.mxu0 %v2423_v49  ;;  %1027 = vmatpush1.bf16.msra.mxu1 %v2426_v50 }
  0x4e   :  { %915 = vmatprep.subr.bf16.mxu0 %v2432_v51  ;;  %1028 = vmatprep.subr.bf16.mxu1 %v2435_v52 }
  0x4f   :  { %734 = vmatmul.mubr.bf16.gmra.mxu0 %v2617_v53  ;;  %847 = vmatmul.mubr.bf16.gmra.mxu1 %v2617_v53 }
  0x50   :  { %743 = vmatprep.mubr.bf16.mxu0 %v2577_v0  ;;  %856 = vmatprep.mubr.bf16.mxu1 %v2577_v0 }
  0x51   :  { %916 = vmatpush1.bf16.msra.mxu0 %v2430_v54  ;;  %1029 = vmatpush1.bf16.msra.mxu1 %v2433_v55 }
  0x52   :  { %917 = vmatprep.subr.bf16.mxu0 %v2439_v56  ;;  %1030 = vmatprep.subr.bf16.mxu1 %v2442_v57 }
  0x55   :  { %918 = vmatpush1.bf16.msra.mxu0 %v2437_v58  ;;  %1031 = vmatpush1.bf16.msra.mxu1 %v2440_v59 }
  0x56   :  { %919 = vmatprep.subr.bf16.mxu0 %v2446_v60  ;;  %1032 = vmatprep.subr.bf16.mxu1 %v2449_v61 }
  0x57   :  { %744 = vmatmul.mubr.bf16.gmra.mxu0 %v2623_v62  ;;  %857 = vmatmul.mubr.bf16.gmra.mxu1 %v2623_v62 }
  0x58   :  { %753 = vmatprep.mubr.bf16.mxu0 %v2577_v0  ;;  %866 = vmatprep.mubr.bf16.mxu1 %v2577_v0 }
  0x59   :  { %920 = vmatpush1.bf16.msra.mxu0 %v2444_v63  ;;  %1033 = vmatpush1.bf16.msra.mxu1 %v2447_v1 }
  0x5a   :  { %921 = vmatprep.subr.bf16.mxu0 %v2453_v2  ;;  %1034 = vmatprep.subr.bf16.mxu1 %v2456_v3 }
  0x5d   :  { %922 = vmatpush1.bf16.msra.mxu0 %v2451_v4  ;;  %1035 = vmatpush1.bf16.msra.mxu1 %v2454_v5 }
  0x5e   :  { %1133 = vmatprep.subr.bf16.mxu0 %v2459_v6  ;;  %1246 = vmatprep.subr.bf16.mxu1 %v2462_v7 }
  0x5f   :  { %754 = vmatmul.mubr.bf16.gmra.mxu0 %v2629_v8  ;;  %867 = vmatmul.mubr.bf16.gmra.mxu1 %v2629_v8 }
  0x60   :  { %763 = vmatprep.mubr.bf16.mxu0 %v2577_v0  ;;  %876 = vmatprep.mubr.bf16.mxu1 %v2577_v0 }
  0x67   :  { %764 = vmatmul.mubr.bf16.gmra.mxu0 %v2635_v9  ;;  %877 = vmatmul.mubr.bf16.gmra.mxu1 %v2635_v9 }
  0x68   :  { %773 = vmatprep.mubr.bf16.mxu0 %v2577_v0  ;;  %886 = vmatprep.mubr.bf16.mxu1 %v2577_v0 }
  0x6f   :  { %774 = vmatmul.mubr.bf16.gmra.mxu0 %v2641_v10  ;;  %887 = vmatmul.mubr.bf16.gmra.mxu1 %v2641_v10 }
  0x70   :  { %783 = vmatprep.mubr.bf16.mxu0 %v2577_v0  ;;  %896 = vmatprep.mubr.bf16.mxu1 %v2577_v0 }
  0x77   :  { %784 = vmatmul.mubr.bf16.gmra.mxu0 %v2647_v11  ;;  %897 = vmatmul.mubr.bf16.gmra.mxu1 %v2647_v11 }
  0x78   :  { %939 = vmatprep.mubr.bf16.mxu0 %v2577_v0  ;;  %1052 = vmatprep.mubr.bf16.mxu1 %v2577_v0 }
  0x7f   :  { %940 = vmatmul.mubr.bf16.vlgmr.msra.gmra.mxu0 %v2605_v35  ;;  %1053 = vmatmul.mubr.bf16.vlgmr.msra.gmra.mxu1 %v2605_v35 }
  0x80   :  { %1134 = vmatpush1.bf16.msra.mxu0 %v2457_v12  ;;  %1247 = vmatpush1.bf16.msra.mxu1 %v2460_v13 }
  0x81   :  { %949 = vmatprep.mubr.bf16.mxu0 %v2577_v0  ;;  %1062 = vmatprep.mubr.bf16.mxu1 %v2577_v0 }
  0x82   :  { %1135 = vmatprep.subr.bf16.mxu0 %v2465_v14  ;;  %1248 = vmatprep.subr.bf16.mxu1 %v2468_v15 }
  0x84   :  { %1136 = vmatpush1.bf16.msra.mxu0 %v2463_v16  ;;  %1249 = vmatpush1.bf16.msra.mxu1 %v2466_v17 }
  0x85   :  { %1137 = vmatprep.subr.bf16.mxu0 %v2471_v18  ;;  %1250 = vmatprep.subr.bf16.mxu1 %v2474_v19 }
  0x87   :  { %950 = vmatmul.mubr.bf16.gmra.mxu0 %v2611_v44  ;;  %1063 = vmatmul.mubr.bf16.gmra.mxu1 %v2611_v44 }
  0x88   :  { %959 = vmatprep.mubr.bf16.mxu0 %v2577_v0  ;;  %1072 = vmatprep.mubr.bf16.mxu1 %v2577_v0 }
  0x89   :  { %1138 = vmatpush1.bf16.msra.mxu0 %v2469_v20  ;;  %1251 = vmatpush1.bf16.msra.mxu1 %v2472_v21 }
  0x8a   :  { %1139 = vmatprep.subr.bf16.mxu0 %v2477_v22  ;;  %1252 = vmatprep.subr.bf16.mxu1 %v2480_v23 }
  0x8d   :  { %1140 = vmatpush1.bf16.msra.mxu0 %v2475_v24  ;;  %1253 = vmatpush1.bf16.msra.mxu1 %v2478_v25 }
  0x8e   :  { %1141 = vmatprep.subr.bf16.mxu0 %v2483_v26  ;;  %1254 = vmatprep.subr.bf16.mxu1 %v2486_v27 }
  0x8f   :  { %960 = vmatmul.mubr.bf16.gmra.mxu0 %v2617_v53  ;;  %1073 = vmatmul.mubr.bf16.gmra.mxu1 %v2617_v53 }
  0x90   :  { %969 = vmatprep.mubr.bf16.mxu0 %v2577_v0  ;;  %1082 = vmatprep.mubr.bf16.mxu1 %v2577_v0 }
  0x91   :  { %1142 = vmatpush1.bf16.msra.mxu0 %v2481_v28  ;;  %1255 = vmatpush1.bf16.msra.mxu1 %v2484_v29 }
  0x92   :  { %1143 = vmatprep.subr.bf16.mxu0 %v2489_v30  ;;  %1256 = vmatprep.subr.bf16.mxu1 %v2492_v31 }
  0x95   :  { %1144 = vmatpush1.bf16.msra.mxu0 %v2487_v32  ;;  %1257 = vmatpush1.bf16.msra.mxu1 %v2490_v33 }
  0x96   :  { %1145 = vmatprep.subr.bf16.mxu0 %v2495_v34  ;;  %1258 = vmatprep.subr.bf16.mxu1 %v2498_v36 }
  0x97   :  { %970 = vmatmul.mubr.bf16.gmra.mxu0 %v2623_v62  ;;  %1083 = vmatmul.mubr.bf16.gmra.mxu1 %v2623_v62 }
  0x98   :  { %979 = vmatprep.mubr.bf16.mxu0 %v2577_v0  ;;  %1092 = vmatprep.mubr.bf16.mxu1 %v2577_v0 }
  0x99   :  { %1146 = vmatpush1.bf16.msra.mxu0 %v2493_v37  ;;  %1259 = vmatpush1.bf16.msra.mxu1 %v2496_v38 }
  0x9a   :  { %1147 = vmatprep.subr.bf16.mxu0 %v2501_v39  ;;  %1260 = vmatprep.subr.bf16.mxu1 %v2504_v40 }
  0x9d   :  { %1148 = vmatpush1.bf16.msra.mxu0 %v2499_v41  ;;  %1261 = vmatpush1.bf16.msra.mxu1 %v2502_v42 }
  0x9f   :  { %980 = vmatmul.mubr.bf16.gmra.mxu0 %v2629_v8  ;;  %1093 = vmatmul.mubr.bf16.gmra.mxu1 %v2629_v8 }
  0xa0   :  { %989 = vmatprep.mubr.bf16.mxu0 %v2577_v0  ;;  %1102 = vmatprep.mubr.bf16.mxu1 %v2577_v0 }
  0xa7   :  { %990 = vmatmul.mubr.bf16.gmra.mxu0 %v2635_v9  ;;  %1103 = vmatmul.mubr.bf16.gmra.mxu1 %v2635_v9 }
  0xa8   :  { %999 = vmatprep.mubr.bf16.mxu0 %v2577_v0  ;;  %1112 = vmatprep.mubr.bf16.mxu1 %v2577_v0 }
  0xaf   :  { %1000 = vmatmul.mubr.bf16.gmra.mxu0 %v2641_v10  ;;  %1113 = vmatmul.mubr.bf16.gmra.mxu1 %v2641_v10 }
  0xb0   :  { %1009 = vmatprep.mubr.bf16.mxu0 %v2577_v0  ;;  %1122 = vmatprep.mubr.bf16.mxu1 %v2577_v0 }
  0xb7   :  { %1010 = vmatmul.mubr.bf16.gmra.mxu0 %v2647_v11  ;;  %1123 = vmatmul.mubr.bf16.gmra.mxu1 %v2647_v11 }
  0xb8   :  { %1165 = vmatprep.mubr.bf16.mxu0 %v2577_v0  ;;  %1278 = vmatprep.mubr.bf16.mxu1 %v2577_v0 }
  0xbf   :  { %1166 = vmatmul.mubr.bf16.vlgmr.msra.gmra.mxu0 %v2605_v35  ;;  %1279 = vmatmul.mubr.bf16.vlgmr.msra.gmra.mxu1 %v2605_v35 }
  0xc0   :  { %1175 = vmatprep.mubr.bf16.mxu0 %v2577_v0  ;;  %1288 = vmatprep.mubr.bf16.mxu1 %v2577_v0 }
  0xc7   :  { %1176 = vmatmul.mubr.bf16.gmra.mxu0 %v2611_v44  ;;  %1289 = vmatmul.mubr.bf16.gmra.mxu1 %v2611_v44 }
  0xc8   :  { %1185 = vmatprep.mubr.bf16.mxu0 %v2577_v0  ;;  %1298 = vmatprep.mubr.bf16.mxu1 %v2577_v0 }
  0xcf   :  { %1186 = vmatmul.mubr.bf16.gmra.mxu0 %v2617_v53  ;;  %1299 = vmatmul.mubr.bf16.gmra.mxu1 %v2617_v53 }
  0xd0   :  { %1195 = vmatprep.mubr.bf16.mxu0 %v2577_v0  ;;  %1308 = vmatprep.mubr.bf16.mxu1 %v2577_v0 }
  0xd7   :  { %1196 = vmatmul.mubr.bf16.gmra.mxu0 %v2623_v62  ;;  %1309 = vmatmul.mubr.bf16.gmra.mxu1 %v2623_v62 }
  0xd8   :  { %1205 = vmatprep.mubr.bf16.mxu0 %v2577_v0  ;;  %1318 = vmatprep.mubr.bf16.mxu1 %v2577_v0 }
  0xdf   :  { %1206 = vmatmul.mubr.bf16.gmra.mxu0 %v2629_v8  ;;  %1319 = vmatmul.mubr.bf16.gmra.mxu1 %v2629_v8 }
  0xe0   :  { %1215 = vmatprep.mubr.bf16.mxu0 %v2577_v0  ;;  %1328 = vmatprep.mubr.bf16.mxu1 %v2577_v0 }
  0xe7   :  { %1216 = vmatmul.mubr.bf16.gmra.mxu0 %v2635_v9  ;;  %1329 = vmatmul.mubr.bf16.gmra.mxu1 %v2635_v9 }
  0xe8   :  { %1225 = vmatprep.mubr.bf16.mxu0 %v2577_v0  ;;  %1338 = vmatprep.mubr.bf16.mxu1 %v2577_v0 }
  0xef   :  { %1226 = vmatmul.mubr.bf16.gmra.mxu0 %v2641_v10  ;;  %1339 = vmatmul.mubr.bf16.gmra.mxu1 %v2641_v10 }
  0xf0   :  { %1235 = vmatprep.mubr.bf16.mxu0 %v2577_v0  ;;  %1348 = vmatprep.mubr.bf16.mxu1 %v2577_v0 }
  0xf7   :  { %1236 = vmatmul.mubr.bf16.gmra.mxu0 %v2647_v11  ;;  %1349 = vmatmul.mubr.bf16.gmra.mxu1 %v2647_v11 }
  0xff   :  { %v715_v35 = vpop.f32.mrf.mxu0  ;;  %v828_v43 = vpop.f32.mrf.mxu1 }
 0x101   :  { %v717_v44 = vpop.f32.mrf.mxu0  ;;  %v830_v45 = vpop.f32.mrf.mxu1 }
 0x102   :  { %v2249_v46 = vpack.c.bf16 %v717_v44, %v715_v35  ;;  %v2250_v47 = vpack.c.bf16 %v830_v45, %v828_v43 }
 0x103   :  { %v719_v48 = vpop.f32.mrf.mxu0  ;;  %v832_v49 = vpop.f32.mrf.mxu1 }
 0x104   :  { %1935 = vst [vmem:[#allocation7] sm:$0xff] %v2249_v46  ;;  %1936 = vst [vmem:[#allocation7 + $0x8] sm:$0xff] %v2250_v47 }
 0x105   :  { %v721_v50 = vpop.f32.mrf.mxu0  ;;  %v834_v51 = vpop.f32.mrf.mxu1 }
 0x106   :  { %v2255_v52 = vpack.c.bf16 %v721_v50, %v719_v48  ;;  %v2256_v53 = vpack.c.bf16 %v834_v51, %v832_v49 }
 0x107   :  { %v725_v54 = vpop.f32.mrf.mxu0  ;;  %v838_v0 = vpop.f32.mrf.mxu1 }
 0x108   :  { %1941 = vst [vmem:[#allocation7 + $0x30] sm:$0xff] %v2255_v52  ;;  %1942 = vst [vmem:[#allocation7 + $0x38] sm:$0xff] %v2256_v53 }
 0x109   :  { %v727_v55 = vpop.f32.mrf.mxu0  ;;  %v840_v56 = vpop.f32.mrf.mxu1 }
 0x10a   :  { %v2261_v57 = vpack.c.bf16 %v727_v55, %v725_v54  ;;  %v2262_v58 = vpack.c.bf16 %v840_v56, %v838_v0 }
 0x10b   :  { %v729_v59 = vpop.f32.mrf.mxu0  ;;  %v842_v60 = vpop.f32.mrf.mxu1 }
 0x10c   :  { %1947 = vst [vmem:[#allocation7 + $0x60] sm:$0xff] %v2261_v57  ;;  %1948 = vst [vmem:[#allocation7 + $0x68] sm:$0xff] %v2262_v58 }
 0x10d   :  { %v731_v61 = vpop.f32.mrf.mxu0  ;;  %v844_v62 = vpop.f32.mrf.mxu1 }
 0x10e   :  { %v2267_v63 = vpack.c.bf16 %v731_v61, %v729_v59  ;;  %v2268_v1 = vpack.c.bf16 %v844_v62, %v842_v60 }
 0x10f   :  { %v735_v2 = vpop.f32.mrf.mxu0  ;;  %v848_v3 = vpop.f32.mrf.mxu1 }
 0x110   :  { %1953 = vst [vmem:[#allocation7 + $0x90] sm:$0xff] %v2267_v63  ;;  %1954 = vst [vmem:[#allocation7 + $0x98] sm:$0xff] %v2268_v1 }
 0x111   :  { %v737_v4 = vpop.f32.mrf.mxu0  ;;  %v850_v5 = vpop.f32.mrf.mxu1 }
 0x112   :  { %v2273_v6 = vpack.c.bf16 %v737_v4, %v735_v2  ;;  %v2274_v7 = vpack.c.bf16 %v850_v5, %v848_v3 }
 0x113   :  { %v739_v8 = vpop.f32.mrf.mxu0  ;;  %v852_v9 = vpop.f32.mrf.mxu1 }
 0x114   :  { %1959 = vst [vmem:[#allocation7 + $0xc0] sm:$0xff] %v2273_v6  ;;  %1960 = vst [vmem:[#allocation7 + $0xc8] sm:$0xff] %v2274_v7 }
 0x115   :  { %v741_v10 = vpop.f32.mrf.mxu0  ;;  %v854_v11 = vpop.f32.mrf.mxu1 }
 0x116   :  { %v2279_v12 = vpack.c.bf16 %v741_v10, %v739_v8  ;;  %v2280_v13 = vpack.c.bf16 %v854_v11, %v852_v9 }
 0x117   :  { %v745_v14 = vpop.f32.mrf.mxu0  ;;  %v858_v15 = vpop.f32.mrf.mxu1 }
 0x118   :  { %1965 = vst [vmem:[#allocation7 + $0xf0] sm:$0xff] %v2279_v12  ;;  %1966 = vst [vmem:[#allocation7 + $0xf8] sm:$0xff] %v2280_v13 }
 0x119   :  { %v747_v16 = vpop.f32.mrf.mxu0  ;;  %v860_v17 = vpop.f32.mrf.mxu1 }
 0x11a   :  { %v2285_v18 = vpack.c.bf16 %v747_v16, %v745_v14  ;;  %v2286_v19 = vpack.c.bf16 %v860_v17, %v858_v15 }
 0x11b   :  { %v749_v20 = vpop.f32.mrf.mxu0  ;;  %v862_v21 = vpop.f32.mrf.mxu1 }
 0x11c   :  { %1971 = vst [vmem:[#allocation7 + $0x120] sm:$0xff] %v2285_v18  ;;  %1972 = vst [vmem:[#allocation7 + $0x128] sm:$0xff] %v2286_v19 }
 0x11d   :  { %v751_v22 = vpop.f32.mrf.mxu0  ;;  %v864_v23 = vpop.f32.mrf.mxu1 }
 0x11e   :  { %v2291_v24 = vpack.c.bf16 %v751_v22, %v749_v20  ;;  %v2292_v25 = vpack.c.bf16 %v864_v23, %v862_v21 }
 0x11f   :  { %v755_v26 = vpop.f32.mrf.mxu0  ;;  %v868_v27 = vpop.f32.mrf.mxu1 }
 0x120   :  { %1977 = vst [vmem:[#allocation7 + $0x150] sm:$0xff] %v2291_v24  ;;  %1978 = vst [vmem:[#allocation7 + $0x158] sm:$0xff] %v2292_v25 }
 0x121   :  { %v757_v28 = vpop.f32.mrf.mxu0  ;;  %v870_v29 = vpop.f32.mrf.mxu1 }
 0x122   :  { %v2297_v30 = vpack.c.bf16 %v757_v28, %v755_v26  ;;  %v2298_v31 = vpack.c.bf16 %v870_v29, %v868_v27 }
 0x123   :  { %v759_v32 = vpop.f32.mrf.mxu0  ;;  %v872_v33 = vpop.f32.mrf.mxu1 }
 0x124   :  { %1983 = vst [vmem:[#allocation7 + $0x180] sm:$0xff] %v2297_v30  ;;  %1984 = vst [vmem:[#allocation7 + $0x188] sm:$0xff] %v2298_v31 }
 0x125   :  { %v761_v34 = vpop.f32.mrf.mxu0  ;;  %v874_v36 = vpop.f32.mrf.mxu1 }
 0x126   :  { %v2303_v37 = vpack.c.bf16 %v761_v34, %v759_v32  ;;  %v2304_v38 = vpack.c.bf16 %v874_v36, %v872_v33 }
 0x127   :  { %v765_v39 = vpop.f32.mrf.mxu0  ;;  %v878_v40 = vpop.f32.mrf.mxu1 }
 0x128   :  { %1989 = vst [vmem:[#allocation7 + $0x1b0] sm:$0xff] %v2303_v37  ;;  %1990 = vst [vmem:[#allocation7 + $0x1b8] sm:$0xff] %v2304_v38 }
 0x129   :  { %v767_v41 = vpop.f32.mrf.mxu0  ;;  %v880_v42 = vpop.f32.mrf.mxu1 }
 0x12a   :  { %v2309_v35 = vpack.c.bf16 %v767_v41, %v765_v39  ;;  %v2310_v43 = vpack.c.bf16 %v880_v42, %v878_v40 }
 0x12b   :  { %v769_v44 = vpop.f32.mrf.mxu0  ;;  %v882_v45 = vpop.f32.mrf.mxu1 }
 0x12c   :  { %1995 = vst [vmem:[#allocation7 + $0x1e0] sm:$0xff] %v2309_v35  ;;  %1996 = vst [vmem:[#allocation7 + $0x1e8] sm:$0xff] %v2310_v43 }
 0x12d   :  { %v771_v46 = vpop.f32.mrf.mxu0  ;;  %v884_v47 = vpop.f32.mrf.mxu1 }
 0x12e   :  { %v2315_v48 = vpack.c.bf16 %v771_v46, %v769_v44  ;;  %v2316_v49 = vpack.c.bf16 %v884_v47, %v882_v45 }
 0x12f   :  { %v775_v50 = vpop.f32.mrf.mxu0  ;;  %v888_v51 = vpop.f32.mrf.mxu1 }
 0x130   :  { %2001 = vst [vmem:[#allocation7 + $0x210] sm:$0xff] %v2315_v48  ;;  %2002 = vst [vmem:[#allocation7 + $0x218] sm:$0xff] %v2316_v49 }
 0x131   :  { %v777_v52 = vpop.f32.mrf.mxu0  ;;  %v890_v53 = vpop.f32.mrf.mxu1 }
 0x132   :  { %v2321_v54 = vpack.c.bf16 %v777_v52, %v775_v50  ;;  %v2322_v0 = vpack.c.bf16 %v890_v53, %v888_v51 }
 0x133   :  { %v779_v55 = vpop.f32.mrf.mxu0  ;;  %v892_v56 = vpop.f32.mrf.mxu1 }
 0x134   :  { %2007 = vst [vmem:[#allocation7 + $0x240] sm:$0xff] %v2321_v54  ;;  %2008 = vst [vmem:[#allocation7 + $0x248] sm:$0xff] %v2322_v0 }
 0x135   :  { %v781_v57 = vpop.f32.mrf.mxu0  ;;  %v894_v58 = vpop.f32.mrf.mxu1 }
 0x136   :  { %v2327_v59 = vpack.c.bf16 %v781_v57, %v779_v55  ;;  %v2328_v60 = vpack.c.bf16 %v894_v58, %v892_v56 }
 0x137   :  { %v785_v61 = vpop.f32.mrf.mxu0  ;;  %v898_v62 = vpop.f32.mrf.mxu1 }
 0x138   :  { %2013 = vst [vmem:[#allocation7 + $0x270] sm:$0xff] %v2327_v59  ;;  %2014 = vst [vmem:[#allocation7 + $0x278] sm:$0xff] %v2328_v60 }
 0x139   :  { %v787_v63 = vpop.f32.mrf.mxu0  ;;  %v900_v1 = vpop.f32.mrf.mxu1 }
 0x13a   :  { %v2333_v2 = vpack.c.bf16 %v787_v63, %v785_v61  ;;  %v2334_v3 = vpack.c.bf16 %v900_v1, %v898_v62 }
 0x13b   :  { %v789_v4 = vpop.f32.mrf.mxu0  ;;  %v902_v5 = vpop.f32.mrf.mxu1 }
 0x13c   :  { %2019 = vst [vmem:[#allocation7 + $0x2a0] sm:$0xff] %v2333_v2  ;;  %2020 = vst [vmem:[#allocation7 + $0x2a8] sm:$0xff] %v2334_v3 }
 0x13d   :  { %v791_v6 = vpop.f32.mrf.mxu0  ;;  %v904_v7 = vpop.f32.mrf.mxu1 }
 0x13e   :  { %v2339_v8 = vpack.c.bf16 %v791_v6, %v789_v4  ;;  %v2340_v9 = vpack.c.bf16 %v904_v7, %v902_v5 }
 0x13f   :  { %v941_v10 = vpop.f32.mrf.mxu0  ;;  %v1054_v11 = vpop.f32.mrf.mxu1 }
 0x140   :  { %2025 = vst [vmem:[#allocation7 + $0x2d0] sm:$0xff] %v2339_v8  ;;  %2026 = vst [vmem:[#allocation7 + $0x2d8] sm:$0xff] %v2340_v9 }
 0x141   :  { %v943_v12 = vpop.f32.mrf.mxu0  ;;  %v1056_v13 = vpop.f32.mrf.mxu1 }
 0x142   :  { %v2251_v14 = vpack.c.bf16 %v943_v12, %v941_v10  ;;  %v2252_v15 = vpack.c.bf16 %v1056_v13, %v1054_v11 }
 0x143   :  { %v945_v16 = vpop.f32.mrf.mxu0  ;;  %v1058_v17 = vpop.f32.mrf.mxu1 }
 0x144   :  { %1937 = vst [vmem:[#allocation7 + $0x10] sm:$0xff] %v2251_v14  ;;  %1938 = vst [vmem:[#allocation7 + $0x18] sm:$0xff] %v2252_v15 }
 0x145   :  { %v947_v18 = vpop.f32.mrf.mxu0  ;;  %v1060_v19 = vpop.f32.mrf.mxu1 }
 0x146   :  { %v2257_v20 = vpack.c.bf16 %v947_v18, %v945_v16  ;;  %v2258_v21 = vpack.c.bf16 %v1060_v19, %v1058_v17 }
 0x147   :  { %v951_v22 = vpop.f32.mrf.mxu0  ;;  %v1064_v23 = vpop.f32.mrf.mxu1 }
 0x148   :  { %1943 = vst [vmem:[#allocation7 + $0x40] sm:$0xff] %v2257_v20  ;;  %1944 = vst [vmem:[#allocation7 + $0x48] sm:$0xff] %v2258_v21 }
 0x149   :  { %v953_v24 = vpop.f32.mrf.mxu0  ;;  %v1066_v25 = vpop.f32.mrf.mxu1 }
 0x14a   :  { %v2263_v26 = vpack.c.bf16 %v953_v24, %v951_v22  ;;  %v2264_v27 = vpack.c.bf16 %v1066_v25, %v1064_v23 }
 0x14b   :  { %v955_v28 = vpop.f32.mrf.mxu0  ;;  %v1068_v29 = vpop.f32.mrf.mxu1 }
 0x14c   :  { %1949 = vst [vmem:[#allocation7 + $0x70] sm:$0xff] %v2263_v26  ;;  %1950 = vst [vmem:[#allocation7 + $0x78] sm:$0xff] %v2264_v27 }
 0x14d   :  { %v957_v30 = vpop.f32.mrf.mxu0  ;;  %v1070_v31 = vpop.f32.mrf.mxu1 }
 0x14e   :  { %v2269_v32 = vpack.c.bf16 %v957_v30, %v955_v28  ;;  %v2270_v33 = vpack.c.bf16 %v1070_v31, %v1068_v29 }
 0x14f   :  { %v961_v34 = vpop.f32.mrf.mxu0  ;;  %v1074_v36 = vpop.f32.mrf.mxu1 }
 0x150   :  { %1955 = vst [vmem:[#allocation7 + $0xa0] sm:$0xff] %v2269_v32  ;;  %1956 = vst [vmem:[#allocation7 + $0xa8] sm:$0xff] %v2270_v33 }
 0x151   :  { %v963_v37 = vpop.f32.mrf.mxu0  ;;  %v1076_v38 = vpop.f32.mrf.mxu1 }
 0x152   :  { %v2275_v39 = vpack.c.bf16 %v963_v37, %v961_v34  ;;  %v2276_v40 = vpack.c.bf16 %v1076_v38, %v1074_v36 }
 0x153   :  { %v965_v41 = vpop.f32.mrf.mxu0  ;;  %v1078_v42 = vpop.f32.mrf.mxu1 }
 0x154   :  { %1961 = vst [vmem:[#allocation7 + $0xd0] sm:$0xff] %v2275_v39  ;;  %1962 = vst [vmem:[#allocation7 + $0xd8] sm:$0xff] %v2276_v40 }
 0x155   :  { %v967_v35 = vpop.f32.mrf.mxu0  ;;  %v1080_v43 = vpop.f32.mrf.mxu1 }
 0x156   :  { %v2281_v44 = vpack.c.bf16 %v967_v35, %v965_v41  ;;  %v2282_v45 = vpack.c.bf16 %v1080_v43, %v1078_v42 }
 0x157   :  { %v971_v46 = vpop.f32.mrf.mxu0  ;;  %v1084_v47 = vpop.f32.mrf.mxu1 }
 0x158   :  { %1967 = vst [vmem:[#allocation7 + $0x100] sm:$0xff] %v2281_v44  ;;  %1968 = vst [vmem:[#allocation7 + $0x108] sm:$0xff] %v2282_v45 }
 0x159   :  { %v973_v48 = vpop.f32.mrf.mxu0  ;;  %v1086_v49 = vpop.f32.mrf.mxu1 }
 0x15a   :  { %v2287_v50 = vpack.c.bf16 %v973_v48, %v971_v46  ;;  %v2288_v51 = vpack.c.bf16 %v1086_v49, %v1084_v47 }
 0x15b   :  { %v975_v52 = vpop.f32.mrf.mxu0  ;;  %v1088_v53 = vpop.f32.mrf.mxu1 }
 0x15c   :  { %1973 = vst [vmem:[#allocation7 + $0x130] sm:$0xff] %v2287_v50  ;;  %1974 = vst [vmem:[#allocation7 + $0x138] sm:$0xff] %v2288_v51 }
 0x15d   :  { %v977_v54 = vpop.f32.mrf.mxu0  ;;  %v1090_v0 = vpop.f32.mrf.mxu1 }
 0x15e   :  { %v2293_v55 = vpack.c.bf16 %v977_v54, %v975_v52  ;;  %v2294_v56 = vpack.c.bf16 %v1090_v0, %v1088_v53 }
 0x15f   :  { %v981_v57 = vpop.f32.mrf.mxu0  ;;  %v1094_v58 = vpop.f32.mrf.mxu1 }
 0x160   :  { %1979 = vst [vmem:[#allocation7 + $0x160] sm:$0xff] %v2293_v55  ;;  %1980 = vst [vmem:[#allocation7 + $0x168] sm:$0xff] %v2294_v56 }
 0x161   :  { %v983_v59 = vpop.f32.mrf.mxu0  ;;  %v1096_v60 = vpop.f32.mrf.mxu1 }
 0x162   :  { %v2299_v61 = vpack.c.bf16 %v983_v59, %v981_v57  ;;  %v2300_v62 = vpack.c.bf16 %v1096_v60, %v1094_v58 }
 0x163   :  { %v985_v63 = vpop.f32.mrf.mxu0  ;;  %v1098_v1 = vpop.f32.mrf.mxu1 }
 0x164   :  { %1985 = vst [vmem:[#allocation7 + $0x190] sm:$0xff] %v2299_v61  ;;  %1986 = vst [vmem:[#allocation7 + $0x198] sm:$0xff] %v2300_v62 }
 0x165   :  { %v987_v2 = vpop.f32.mrf.mxu0  ;;  %v1100_v3 = vpop.f32.mrf.mxu1 }
 0x166   :  { %v2305_v4 = vpack.c.bf16 %v987_v2, %v985_v63  ;;  %v2306_v5 = vpack.c.bf16 %v1100_v3, %v1098_v1 }
 0x167   :  { %v991_v6 = vpop.f32.mrf.mxu0  ;;  %v1104_v7 = vpop.f32.mrf.mxu1 }
 0x168   :  { %1991 = vst [vmem:[#allocation7 + $0x1c0] sm:$0xff] %v2305_v4  ;;  %1992 = vst [vmem:[#allocation7 + $0x1c8] sm:$0xff] %v2306_v5 }
 0x169   :  { %v993_v8 = vpop.f32.mrf.mxu0  ;;  %v1106_v9 = vpop.f32.mrf.mxu1 }
 0x16a   :  { %v2311_v10 = vpack.c.bf16 %v993_v8, %v991_v6  ;;  %v2312_v11 = vpack.c.bf16 %v1106_v9, %v1104_v7 }
 0x16b   :  { %v995_v12 = vpop.f32.mrf.mxu0  ;;  %v1108_v13 = vpop.f32.mrf.mxu1 }
 0x16c   :  { %1997 = vst [vmem:[#allocation7 + $0x1f0] sm:$0xff] %v2311_v10  ;;  %1998 = vst [vmem:[#allocation7 + $0x1f8] sm:$0xff] %v2312_v11 }
 0x16d   :  { %v997_v14 = vpop.f32.mrf.mxu0  ;;  %v1110_v15 = vpop.f32.mrf.mxu1 }
 0x16e   :  { %v2317_v16 = vpack.c.bf16 %v997_v14, %v995_v12  ;;  %v2318_v17 = vpack.c.bf16 %v1110_v15, %v1108_v13 }
 0x16f   :  { %v1001_v18 = vpop.f32.mrf.mxu0  ;;  %v1114_v19 = vpop.f32.mrf.mxu1 }
 0x170   :  { %2003 = vst [vmem:[#allocation7 + $0x220] sm:$0xff] %v2317_v16  ;;  %2004 = vst [vmem:[#allocation7 + $0x228] sm:$0xff] %v2318_v17 }
 0x171   :  { %v1003_v20 = vpop.f32.mrf.mxu0  ;;  %v1116_v21 = vpop.f32.mrf.mxu1 }
 0x172   :  { %v2323_v22 = vpack.c.bf16 %v1003_v20, %v1001_v18  ;;  %v2324_v23 = vpack.c.bf16 %v1116_v21, %v1114_v19 }
 0x173   :  { %v1005_v24 = vpop.f32.mrf.mxu0  ;;  %v1118_v25 = vpop.f32.mrf.mxu1 }
 0x174   :  { %2009 = vst [vmem:[#allocation7 + $0x250] sm:$0xff] %v2323_v22  ;;  %2010 = vst [vmem:[#allocation7 + $0x258] sm:$0xff] %v2324_v23 }
 0x175   :  { %v1007_v26 = vpop.f32.mrf.mxu0  ;;  %v1120_v27 = vpop.f32.mrf.mxu1 }
 0x176   :  { %v2329_v28 = vpack.c.bf16 %v1007_v26, %v1005_v24  ;;  %v2330_v29 = vpack.c.bf16 %v1120_v27, %v1118_v25 }
 0x177   :  { %v1011_v30 = vpop.f32.mrf.mxu0  ;;  %v1124_v31 = vpop.f32.mrf.mxu1 }
 0x178   :  { %2015 = vst [vmem:[#allocation7 + $0x280] sm:$0xff] %v2329_v28  ;;  %2016 = vst [vmem:[#allocation7 + $0x288] sm:$0xff] %v2330_v29 }
 0x179   :  { %v1013_v32 = vpop.f32.mrf.mxu0  ;;  %v1126_v33 = vpop.f32.mrf.mxu1 }
 0x17a   :  { %v2335_v34 = vpack.c.bf16 %v1013_v32, %v1011_v30  ;;  %v2336_v36 = vpack.c.bf16 %v1126_v33, %v1124_v31 }
 0x17b   :  { %v1015_v37 = vpop.f32.mrf.mxu0  ;;  %v1128_v38 = vpop.f32.mrf.mxu1 }
 0x17c   :  { %2021 = vst [vmem:[#allocation7 + $0x2b0] sm:$0xff] %v2335_v34  ;;  %2022 = vst [vmem:[#allocation7 + $0x2b8] sm:$0xff] %v2336_v36 }
 0x17d   :  { %v1017_v39 = vpop.f32.mrf.mxu0  ;;  %v1130_v40 = vpop.f32.mrf.mxu1 }
 0x17e   :  { %v2341_v41 = vpack.c.bf16 %v1017_v39, %v1015_v37  ;;  %v2342_v42 = vpack.c.bf16 %v1130_v40, %v1128_v38 }
 0x17f   :  { %v1167_v35 = vpop.f32.mrf.mxu0  ;;  %v1280_v43 = vpop.f32.mrf.mxu1 }
 0x180   :  { %2027 = vst [vmem:[#allocation7 + $0x2e0] sm:$0xff] %v2341_v41  ;;  %2028 = vst [vmem:[#allocation7 + $0x2e8] sm:$0xff] %v2342_v42 }
 0x181   :  { %v1169_v44 = vpop.f32.mrf.mxu0  ;;  %v1282_v45 = vpop.f32.mrf.mxu1 }
 0x182   :  { %v2253_v46 = vpack.c.bf16 %v1169_v44, %v1167_v35  ;;  %v2254_v47 = vpack.c.bf16 %v1282_v45, %v1280_v43 }
 0x183   :  { %v1171_v48 = vpop.f32.mrf.mxu0  ;;  %v1284_v49 = vpop.f32.mrf.mxu1 }
 0x184   :  { %1939 = vst [vmem:[#allocation7 + $0x20] sm:$0xff] %v2253_v46  ;;  %1940 = vst [vmem:[#allocation7 + $0x28] sm:$0xff] %v2254_v47 }
 0x185   :  { %v1173_v50 = vpop.f32.mrf.mxu0  ;;  %v1286_v51 = vpop.f32.mrf.mxu1 }
 0x186   :  { %v2259_v52 = vpack.c.bf16 %v1173_v50, %v1171_v48  ;;  %v2260_v53 = vpack.c.bf16 %v1286_v51, %v1284_v49 }
 0x187   :  { %v1177_v54 = vpop.f32.mrf.mxu0  ;;  %v1290_v0 = vpop.f32.mrf.mxu1 }
 0x188   :  { %1945 = vst [vmem:[#allocation7 + $0x50] sm:$0xff] %v2259_v52  ;;  %1946 = vst [vmem:[#allocation7 + $0x58] sm:$0xff] %v2260_v53 }
 0x189   :  { %v1179_v55 = vpop.f32.mrf.mxu0  ;;  %v1292_v56 = vpop.f32.mrf.mxu1 }
 0x18a   :  { %v2265_v57 = vpack.c.bf16 %v1179_v55, %v1177_v54  ;;  %v2266_v58 = vpack.c.bf16 %v1292_v56, %v1290_v0 }
 0x18b   :  { %v1181_v59 = vpop.f32.mrf.mxu0  ;;  %v1294_v60 = vpop.f32.mrf.mxu1 }
 0x18c   :  { %1951 = vst [vmem:[#allocation7 + $0x80] sm:$0xff] %v2265_v57  ;;  %1952 = vst [vmem:[#allocation7 + $0x88] sm:$0xff] %v2266_v58 }
 0x18d   :  { %v1183_v61 = vpop.f32.mrf.mxu0  ;;  %v1296_v62 = vpop.f32.mrf.mxu1 }
 0x18e   :  { %v2271_v63 = vpack.c.bf16 %v1183_v61, %v1181_v59  ;;  %v2272_v1 = vpack.c.bf16 %v1296_v62, %v1294_v60 }
 0x18f   :  { %v1187_v2 = vpop.f32.mrf.mxu0  ;;  %v1300_v3 = vpop.f32.mrf.mxu1 }
 0x190   :  { %1957 = vst [vmem:[#allocation7 + $0xb0] sm:$0xff] %v2271_v63  ;;  %1958 = vst [vmem:[#allocation7 + $0xb8] sm:$0xff] %v2272_v1 }
 0x191   :  { %v1189_v4 = vpop.f32.mrf.mxu0  ;;  %v1302_v5 = vpop.f32.mrf.mxu1 }
 0x192   :  { %v2277_v6 = vpack.c.bf16 %v1189_v4, %v1187_v2  ;;  %v2278_v7 = vpack.c.bf16 %v1302_v5, %v1300_v3 }
 0x193   :  { %v1191_v8 = vpop.f32.mrf.mxu0  ;;  %v1304_v9 = vpop.f32.mrf.mxu1 }
 0x194   :  { %1963 = vst [vmem:[#allocation7 + $0xe0] sm:$0xff] %v2277_v6  ;;  %1964 = vst [vmem:[#allocation7 + $0xe8] sm:$0xff] %v2278_v7 }
 0x195   :  { %v1193_v10 = vpop.f32.mrf.mxu0  ;;  %v1306_v11 = vpop.f32.mrf.mxu1 }
 0x196   :  { %v2283_v12 = vpack.c.bf16 %v1193_v10, %v1191_v8  ;;  %v2284_v13 = vpack.c.bf16 %v1306_v11, %v1304_v9 }
 0x197   :  { %v1197_v14 = vpop.f32.mrf.mxu0  ;;  %v1310_v15 = vpop.f32.mrf.mxu1 }
 0x198   :  { %1969 = vst [vmem:[#allocation7 + $0x110] sm:$0xff] %v2283_v12  ;;  %1970 = vst [vmem:[#allocation7 + $0x118] sm:$0xff] %v2284_v13 }
 0x199   :  { %v1199_v16 = vpop.f32.mrf.mxu0  ;;  %v1312_v17 = vpop.f32.mrf.mxu1 }
 0x19a   :  { %v2289_v18 = vpack.c.bf16 %v1199_v16, %v1197_v14  ;;  %v2290_v19 = vpack.c.bf16 %v1312_v17, %v1310_v15 }
 0x19b   :  { %v1201_v20 = vpop.f32.mrf.mxu0  ;;  %v1314_v21 = vpop.f32.mrf.mxu1 }
 0x19c   :  { %1975 = vst [vmem:[#allocation7 + $0x140] sm:$0xff] %v2289_v18  ;;  %1976 = vst [vmem:[#allocation7 + $0x148] sm:$0xff] %v2290_v19 }
 0x19d   :  { %v1203_v22 = vpop.f32.mrf.mxu0  ;;  %v1316_v23 = vpop.f32.mrf.mxu1 }
 0x19e   :  { %v2295_v24 = vpack.c.bf16 %v1203_v22, %v1201_v20  ;;  %v2296_v25 = vpack.c.bf16 %v1316_v23, %v1314_v21 }
 0x19f   :  { %v1207_v26 = vpop.f32.mrf.mxu0  ;;  %v1320_v27 = vpop.f32.mrf.mxu1 }
 0x1a0   :  { %1981 = vst [vmem:[#allocation7 + $0x170] sm:$0xff] %v2295_v24  ;;  %1982 = vst [vmem:[#allocation7 + $0x178] sm:$0xff] %v2296_v25 }
 0x1a1   :  { %v1209_v28 = vpop.f32.mrf.mxu0  ;;  %v1322_v29 = vpop.f32.mrf.mxu1 }
 0x1a2   :  { %v2301_v30 = vpack.c.bf16 %v1209_v28, %v1207_v26  ;;  %v2302_v31 = vpack.c.bf16 %v1322_v29, %v1320_v27 }
 0x1a3   :  { %v1211_v32 = vpop.f32.mrf.mxu0  ;;  %v1324_v33 = vpop.f32.mrf.mxu1 }
 0x1a4   :  { %1987 = vst [vmem:[#allocation7 + $0x1a0] sm:$0xff] %v2301_v30  ;;  %1988 = vst [vmem:[#allocation7 + $0x1a8] sm:$0xff] %v2302_v31 }
 0x1a5   :  { %v1213_v34 = vpop.f32.mrf.mxu0  ;;  %v1326_v36 = vpop.f32.mrf.mxu1 }
 0x1a6   :  { %v2307_v37 = vpack.c.bf16 %v1213_v34, %v1211_v32  ;;  %v2308_v38 = vpack.c.bf16 %v1326_v36, %v1324_v33 }
 0x1a7   :  { %v1217_v39 = vpop.f32.mrf.mxu0  ;;  %v1330_v40 = vpop.f32.mrf.mxu1 }
 0x1a8   :  { %1993 = vst [vmem:[#allocation7 + $0x1d0] sm:$0xff] %v2307_v37  ;;  %1994 = vst [vmem:[#allocation7 + $0x1d8] sm:$0xff] %v2308_v38 }
 0x1a9   :  { %v1219_v41 = vpop.f32.mrf.mxu0  ;;  %v1332_v42 = vpop.f32.mrf.mxu1 }
 0x1aa   :  { %v2313_v35 = vpack.c.bf16 %v1219_v41, %v1217_v39  ;;  %v2314_v43 = vpack.c.bf16 %v1332_v42, %v1330_v40 }
 0x1ab   :  { %v1221_v44 = vpop.f32.mrf.mxu0  ;;  %v1334_v45 = vpop.f32.mrf.mxu1 }
 0x1ac   :  { %1999 = vst [vmem:[#allocation7 + $0x200] sm:$0xff] %v2313_v35  ;;  %2000 = vst [vmem:[#allocation7 + $0x208] sm:$0xff] %v2314_v43 }
 0x1ad   :  { %v1223_v46 = vpop.f32.mrf.mxu0  ;;  %v1336_v47 = vpop.f32.mrf.mxu1 }
 0x1ae   :  { %v2319_v48 = vpack.c.bf16 %v1223_v46, %v1221_v44  ;;  %v2320_v49 = vpack.c.bf16 %v1336_v47, %v1334_v45 }
 0x1af   :  { %v1227_v50 = vpop.f32.mrf.mxu0  ;;  %v1340_v51 = vpop.f32.mrf.mxu1 }
 0x1b0   :  { %2005 = vst [vmem:[#allocation7 + $0x230] sm:$0xff] %v2319_v48  ;;  %2006 = vst [vmem:[#allocation7 + $0x238] sm:$0xff] %v2320_v49 }
 0x1b1   :  { %v1229_v52 = vpop.f32.mrf.mxu0  ;;  %v1342_v53 = vpop.f32.mrf.mxu1 }
 0x1b2   :  { %v2325_v54 = vpack.c.bf16 %v1229_v52, %v1227_v50  ;;  %v2326_v0 = vpack.c.bf16 %v1342_v53, %v1340_v51 }
 0x1b3   :  { %v1231_v55 = vpop.f32.mrf.mxu0  ;;  %v1344_v56 = vpop.f32.mrf.mxu1 }
 0x1b4   :  { %2011 = vst [vmem:[#allocation7 + $0x260] sm:$0xff] %v2325_v54  ;;  %2012 = vst [vmem:[#allocation7 + $0x268] sm:$0xff] %v2326_v0 }
 0x1b5   :  { %v1233_v57 = vpop.f32.mrf.mxu0  ;;  %v1346_v58 = vpop.f32.mrf.mxu1 }
 0x1b6   :  { %v2331_v59 = vpack.c.bf16 %v1233_v57, %v1231_v55  ;;  %v2332_v60 = vpack.c.bf16 %v1346_v58, %v1344_v56 }
 0x1b7   :  { %v1237_v61 = vpop.f32.mrf.mxu0  ;;  %v1350_v62 = vpop.f32.mrf.mxu1 }
 0x1b8   :  { %2017 = vst [vmem:[#allocation7 + $0x290] sm:$0xff] %v2331_v59  ;;  %2018 = vst [vmem:[#allocation7 + $0x298] sm:$0xff] %v2332_v60 }
 0x1b9   :  { %v1239_v63 = vpop.f32.mrf.mxu0  ;;  %v1352_v1 = vpop.f32.mrf.mxu1 }
 0x1ba   :  { %v2337_v2 = vpack.c.bf16 %v1239_v63, %v1237_v61  ;;  %v2338_v3 = vpack.c.bf16 %v1352_v1, %v1350_v62 }
 0x1bb   :  { %v1241_v4 = vpop.f32.mrf.mxu0  ;;  %v1354_v5 = vpop.f32.mrf.mxu1 }
 0x1bc   :  { %2023 = vst [vmem:[#allocation7 + $0x2c0] sm:$0xff] %v2337_v2  ;;  %2024 = vst [vmem:[#allocation7 + $0x2c8] sm:$0xff] %v2338_v3 }
 0x1bd   :  { %v1243_v6 = vpop.f32.mrf.mxu0  ;;  %v1356_v7 = vpop.f32.mrf.mxu1 }
 0x1be   :  { %v2343_v8 = vpack.c.bf16 %v1243_v6, %v1241_v4  ;;  %v2344_v9 = vpack.c.bf16 %v1356_v7, %v1354_v5 }
 0x1c0   :  { %2029 = vst [vmem:[#allocation7 + $0x2f0] sm:$0xff] %v2343_v8  ;;  %2030 = vst [vmem:[#allocation7 + $0x2f8] sm:$0xff] %v2344_v9 }
 0x1c1   :  { %2556 = shalt.err (!%p2553_p0)
}
 0x1c2   :  { %2042 = dma.vmem_to_hbm [thread:$0]  %s2037_s1, 12288, %s2723_s2, [#allocation4], %s2575_s19, %s2575_s19, %s2576_s20  }
 0x1c3   :  { %2569 = dma.done.wait [#allocation4], 12288  }
 0x1c4   :  { %2570 = vsyncadd [#allocation4], 4294955008 }
 0x1c5   :  { %2046 = vsyncpa [#allocation3], 1 }
 0x1c6   :  { %2047 = vsyncpa [#allocation6], 1 }
 0x1c7   :  { %2048 = vsyncpa [#allocation4], 1 }

</bundles_post_ra>
